<compile_context>
chip_gen: v7x
topology: tpu7x:2x2x1
jax: 0.10.0
libtpu: 0.0.40
codegen_flags: <defaults>
</compile_context>

<pallas_src>
import functools

import jax
import jax.numpy as jnp
from jax.experimental import pallas as pl
from jax.experimental.pallas import tpu as pltpu

PADDING_ID = 58100
LN_EPS = 1e-5


def _round_up(x, m):
    return (x + m - 1) // m * m


def _vmem_budget_bytes():
    """Usable VMEM budget (7/8 of physical, clamped), per-generation aware."""
    try:
        phys = int(pltpu.get_tpu_info().vmem_capacity_bytes)
    except Exception:
        phys = 64 * 1024 * 1024            # conservative (v7x-sized) fallback
    budget = (phys * 7) // 8               # 56 MiB on v7x, 112 MiB on v5e/v6e
    return max(32 * 1024 * 1024, min(budget, 112 * 1024 * 1024))


def _plan(M, H, L, budget, tm_request):
    """Pick (row tile, weights_resident) under the VMEM budget."""
    bf16, f32 = 2, 4
    # per-row-of-tile pipeline bytes: emb (bf16, 2 bufs) + out (bf16, 2 bufs)
    # + fp32 activation carry scratch
    per_row = H * (2 * bf16 + 2 * bf16 + f32)          # = 12*H bytes / row
    w_resident = 2 * L * (H * H + H) * bf16            # 2 bufs, whole stack
    w_stream = 2 * (H * H + H) * bf16                  # 2 bufs, one layer
    min_tm = min(256, _round_up(M, 16))
    resident = (budget - w_resident) >= per_row * min_tm
    w_bytes = w_resident if resident else w_stream
    tm_cap = (budget - w_bytes) // per_row
    tm = tm_request if tm_request else 1024
    tm = max(16, min(tm, tm_cap, _round_up(M, 16)))
    if tm >= 256:
        tm -= tm % 256                                  # feed the 256-wide MXU
    else:
        tm -= tm % 16                                   # bf16 sublane tile
    return max(tm, 16), resident


# ----------------------------------------------------------------------------
# Fused decoder stack kernel
#   for l in range(L):   x = LayerNorm(x + gelu(x @ W[l] + b[l]))
#   out[l] = x           (activation carried in fp32 VMEM scratch across l)
# grid = (row_tiles, L); row axis "parallel", layer axis "arbitrary".
# ----------------------------------------------------------------------------
def _fused_layers_kernel(emb_ref, w_ref, b_ref, out_ref, x_carry, *, resident):
    l = pl.program_id(1)

    @pl.when(l == 0)
    def _():
        # start of the layer sweep for this row tile: load the embedding tile
        x_carry[...] = emb_ref[...].astype(jnp.float32)

    x = x_carry[...]                                   # fp32 [TM, H]

    # weights arrive in bf16 (no in-kernel H^2 cast); fp32 MXU accumulation
    w = w_ref[l] if resident else w_ref[0]             # bf16 [H, H]
    b = (b_ref[l] if resident else b_ref[0]).astype(jnp.float32)   # [1, H]

    h = jnp.dot(x.astype(jnp.bfloat16), w,
                preferred_element_type=jnp.float32) + b
    h = jax.nn.gelu(h)          # tanh approx (EUP); PyTorch nn.GELU uses erf
    y = x + h

    # centered two-pass LayerNorm (avoids E[y^2]-E[y]^2 cancellation)
    mean = jnp.mean(y, axis=-1, keepdims=True)
    yc = y - mean
    var = jnp.mean(yc * yc, axis=-1, keepdims=True)
    yn = yc * jax.lax.rsqrt(var + LN_EPS)

    x_carry[...] = yn                                  # carry to next layer
    out_ref[0] = yn.astype(out_ref.dtype)              # lane-dense bf16 store


def fused_decoder_stack(emb2d, w_stack, b_stack, *, tm=None,
                        out_dtype=jnp.bfloat16):
    """emb2d: [M, H], w_stack: [L, H, H], b_stack: [L, 1, H] -> [L, M, H]."""
    M, H = emb2d.shape
    L = w_stack.shape[0]
    assert H % 128 == 0, "hidden dim must be lane-dense (multiple of 128)"

    budget = _vmem_budget_bytes()
    tm_eff, resident = _plan(M, H, L, budget, tm)

    Mp = _round_up(M, tm_eff)
    if Mp != M:
        emb2d = jnp.pad(emb2d, ((0, Mp - M), (0, 0)))

    grid = (Mp // tm_eff, L)
    row_tiles = grid[0]

    if resident:
        # whole bf16 weight stack stays resident in VMEM: fetched exactly once
        w_spec = pl.BlockSpec((L, H, H), lambda i, l: (0, 0, 0))
        b_spec = pl.BlockSpec((L, 1, H), lambda i, l: (0, 0, 0))
        w_fetches = 1
    else:
        # per-layer streaming (large L*H^2 that does not fit VMEM)
        # TODO(synk): add K-tiling of the HxH weight for H >= ~2048 on v7x.
        w_spec = pl.BlockSpec((1, H, H), lambda i, l: (l, 0, 0))
        b_spec = pl.BlockSpec((1, 1, H), lambda i, l: (l, 0, 0))
        w_fetches = row_tiles

    out_bytes = jnp.dtype(out_dtype).itemsize
    cost = pl.CostEstimate(
        flops=2 * Mp * H * H * L,
        transcendentals=Mp * H * L,
        bytes_accessed=(Mp * H * 2                      # bf16 embedding read
                        + w_fetches * L * (H * H + H) * 2   # bf16 W + b
                        + L * Mp * H * out_bytes),          # writeback
    )

    out = pl.pallas_call(
        functools.partial(_fused_layers_kernel, resident=resident),
        out_shape=jax.ShapeDtypeStruct((L, Mp, H), out_dtype),
        grid_spec=pltpu.PrefetchScalarGridSpec(
            num_scalar_prefetch=0,
            grid=grid,
            in_specs=[
                # embedding tile: changes only with the row index -> stays
                # resident across the layer axis (fetched once per row tile)
                pl.BlockSpec((tm_eff, H), lambda i, l: (i, 0)),
                w_spec,
                b_spec,
            ],
            out_specs=pl.BlockSpec((1, tm_eff, H), lambda i, l: (l, i, 0)),
            scratch_shapes=[pltpu.VMEM((tm_eff, H), jnp.float32)],
        ),
        compiler_params=pltpu.CompilerParams(
            dimension_semantics=("parallel", "arbitrary"),
            vmem_limit_bytes=budget,
        ),
        cost_estimate=cost,
    )(emb2d.astype(jnp.bfloat16),
      w_stack.astype(jnp.bfloat16),
      b_stack.astype(jnp.bfloat16))

    return out[:, :M, :]


# ----------------------------------------------------------------------------
# HiddenStateEmbedding.forward equivalent
# ----------------------------------------------------------------------------
def hidden_state_embedding_forward(params, input_ids=None, attention_mask=None,
                                   decoder_input_ids=None, labels=None):
    # TODO(synk): the pretrained nmt_model forward (self/cross attention,
    # encoder stack, output_attentions) has no clean in-script equivalent;
    # decoder_hidden_states come from a deterministic synthetic decoder stack
    # whose hot path runs in the fused Pallas kernel above.
    B, S = decoder_input_ids.shape
    # glue: embedding gather (data-dependent gather stays in plain JAX)
    emb = jnp.take(params["embedding"], decoder_input_ids, axis=0)   # [B,S,H] bf16
    H = emb.shape[-1]

    layer_out = fused_decoder_stack(emb.reshape(B * S, H),
                                    params["w_stack"], params["b_stack"])

    hidden_states = (emb,) + tuple(
        layer_out[l].reshape(B, S, H) for l in range(layer_out.shape[0]))
    # torch.no_grad() ~ lax.stop_gradient on the "NMT" outputs
    hidden_states = tuple(jax.lax.stop_gradient(h) for h in hidden_states)

    # (labels != padding_id).long(): plain JAX, XLA fuses the comparison.
    # NOTE: returned as int32 (PyTorch .long() is int64; 32-bit is JAX-native).
    attention_mask_decoder = (labels != PADDING_ID).astype(jnp.int32)
    return hidden_states, attention_mask_decoder


# ----------------------------------------------------------------------------
# Deterministic parameter construction + example run
# ----------------------------------------------------------------------------
def make_params(key, vocab_size, hidden, num_layers):
    keys = jax.random.split(key, 1 + 2 * num_layers)
    embedding = (jax.random.normal(keys[0], (vocab_size, hidden),
                                   dtype=jnp.float32) * 0.02)
    ws, bs = [], []
    for i in range(num_layers):
        ws.append(jax.random.normal(keys[1 + 2 * i], (hidden, hidden),
                                    dtype=jnp.float32) * (hidden ** -0.5))
        bs.append(jax.random.normal(keys[2 + 2 * i], (1, hidden),
                                    dtype=jnp.float32) * 0.01)
    # store model parameters in bf16 in HBM (halves weight DMA traffic)
    return {
        "embedding": embedding.astype(jnp.bfloat16),
        "w_stack": jnp.stack(ws, axis=0).astype(jnp.bfloat16),   # [L, H, H]
        "b_stack": jnp.stack(bs, axis=0).astype(jnp.bfloat16),   # [L, 1, H]
    }


if __name__ == "__main__":
    B, S, H, VOCAB, LAYERS = 2, 8, 128, 64, 2     # H lane-dense (multiple of 128)
    key = jax.random.PRNGKey(0)
    k_par, k_ids, k_dec, k_lab = jax.random.split(key, 4)

    params = make_params(k_par, VOCAB, H, LAYERS)

    input_ids = jax.random.randint(k_ids, (B, S), 0, VOCAB, dtype=jnp.int32)
    attention_mask = jnp.ones((B, S), dtype=jnp.int32)
    decoder_input_ids = jax.random.randint(k_dec, (B, S), 0, VOCAB,
                                           dtype=jnp.int32)
    labels = jax.random.randint(k_lab, (B, S), 0, VOCAB, dtype=jnp.int32)
    # mark the last 3 positions of every sequence as padding
    labels = labels.at[:, -3:].set(PADDING_ID)

    hidden_states, attn_mask_dec = hidden_state_embedding_forward(
        params,
        input_ids=input_ids,
        attention_mask=attention_mask,
        decoder_input_ids=decoder_input_ids,
        labels=labels,
    )

    jax.block_until_ready(hidden_states)
    jax.block_until_ready(attn_mask_dec)

    # sanity checks
    assert len(hidden_states) == LAYERS + 1
    assert all(h.shape == (B, S, H) for h in hidden_states)
    assert attn_mask_dec.shape == (B, S)
    assert int(attn_mask_dec[:, -3:].sum()) == 0
    assert int(attn_mask_dec[:, :-3].sum()) == B * (S - 3)
    assert all(bool(jnp.all(jnp.isfinite(h.astype(jnp.float32))))
               for h in hidden_states)

    print("KERNEL_OK")
</pallas_src>

<mosaic_0001>
module attributes {stable_mosaic.version = 11 : i64} {
  func.func @_fused_layers_kernel(%arg0: i32, %arg1: i32, %arg2: memref<16x128xbf16, #tpu.memory_space<vmem>>, %arg3: memref<2x128x128xbf16, #tpu.memory_space<vmem>>, %arg4: memref<2x1x128xbf16, #tpu.memory_space<vmem>>, %arg5: memref<1x16x128xbf16, #tpu.memory_space<vmem>>, %arg6: memref<16x128xf32, #tpu.memory_space<vmem>>) attributes {dimension_semantics = [#tpu.dimension_semantics<parallel>, #tpu.dimension_semantics<arbitrary>], iteration_bounds = array<i64: 1, 2>, scalar_prefetch = 0 : i64, scratch_operands = 1 : i64, tpu.core_type = #tpu.core_type<tc>, window_params = [{transform_indices = @transform_0, window_bounds = array<i64: 16, 128>}, {pipeline_mode = #tpu.pipeline_mode<synchronous>, transform_indices = @transform_1, window_bounds = array<i64: 2, 128, 128>}, {pipeline_mode = #tpu.pipeline_mode<synchronous>, transform_indices = @transform_2, window_bounds = array<i64: 2, 1, 128>}, {transform_indices = @transform_3, window_bounds = array<i64: 1, 16, 128>}]} {
    %c0_i32 = arith.constant 0 : i32
    %0 = arith.cmpi eq, %arg1, %c0_i32 : i32
    %1 = arith.extui %0 : i1 to i32
    %c0_i32_0 = arith.constant 0 : i32
    %2 = arith.cmpi ne, %1, %c0_i32_0 : i32
    scf.if %2 {
      %c0_20 = arith.constant 0 : index
      %c0_21 = arith.constant 0 : index
      %50 = vector.load %arg2[%c0_20, %c0_21] : memref<16x128xbf16, #tpu.memory_space<vmem>>, vector<16x128xbf16>
      %51 = arith.extf %50 : vector<16x128xbf16> to vector<16x128xf32>
      %c0_22 = arith.constant 0 : index
      %c0_23 = arith.constant 0 : index
      %52 = vector.load %arg6[%c0_22, %c0_23] : memref<16x128xf32, #tpu.memory_space<vmem>>, vector<16x128xf32>
      tpu.vector_store %arg6[%c0_22, %c0_23], %51 {strides = array<i32>} : memref<16x128xf32, #tpu.memory_space<vmem>>, vector<16x128xf32>,
    } else {
    }
    %c0 = arith.constant 0 : index
    %c0_1 = arith.constant 0 : index
    %3 = vector.load %arg6[%c0, %c0_1] : memref<16x128xf32, #tpu.memory_space<vmem>>, vector<16x128xf32>
    %4 = arith.index_cast %arg1 : i32 to index
    %c0_2 = arith.constant 0 : index
    %c0_3 = arith.constant 0 : index
    %5 = vector.load %arg3[%4, %c0_2, %c0_3] : memref<2x128x128xbf16, #tpu.memory_space<vmem>>, vector<1x128x128xbf16>
    %6 = vector.shape_cast %5 : vector<1x128x128xbf16> to vector<128x128xbf16>
    %7 = arith.index_cast %arg1 : i32 to index
    %c0_4 = arith.constant 0 : index
    %c0_5 = arith.constant 0 : index
    %8 = vector.load %arg4[%7, %c0_4, %c0_5] : memref<2x1x128xbf16, #tpu.memory_space<vmem>>, vector<1x1x128xbf16>
    %9 = vector.shape_cast %8 : vector<1x1x128xbf16> to vector<1x128xbf16>
    %10 = arith.extf %9 : vector<1x128xbf16> to vector<1x128xf32>
    %11 = arith.truncf %3 : vector<16x128xf32> to vector<16x128xbf16>
    %cst = arith.constant dense<0.000000e+00> : vector<16x128xf32>
    %12 = tpu.matmul %11, %6, %cst {dimension_numbers = #tpu.dot_dimension_numbers<[1], [0], [0], [1], [0, 0, 1, 1], [], []>} : vector<16x128xbf16>, vector<128x128xbf16>, vector<16x128xf32> -> vector<16x128xf32>
    %13 = vector.broadcast %10 : vector<1x128xf32> to vector<16x128xf32>
    %14 = arith.addf %12, %13 : vector<16x128xf32>
    %15 = arith.mulf %14, %14 : vector<16x128xf32>
    %16 = arith.mulf %14, %15 : vector<16x128xf32>
    %cst_6 = arith.constant 4.471500e-02 : f32
    %17 = vector.broadcast %cst_6 : f32 to vector<16x128xf32>
    %18 = arith.mulf %17, %16 : vector<16x128xf32>
    %19 = arith.addf %14, %18 : vector<16x128xf32>
    %cst_7 = arith.constant 0.797884583 : f32
    %20 = vector.broadcast %cst_7 : f32 to vector<16x128xf32>
    %21 = arith.mulf %20, %19 : vector<16x128xf32>
    %22 = math.tanh %21 : vector<16x128xf32>
    %cst_8 = arith.constant 1.000000e+00 : f32
    %23 = vector.broadcast %cst_8 : f32 to vector<16x128xf32>
    %24 = arith.addf %23, %22 : vector<16x128xf32>
    %cst_9 = arith.constant 5.000000e-01 : f32
    %25 = vector.broadcast %cst_9 : f32 to vector<16x128xf32>
    %26 = arith.mulf %25, %24 : vector<16x128xf32>
    %27 = arith.mulf %14, %26 : vector<16x128xf32>
    %28 = arith.addf %3, %27 : vector<16x128xf32>
    %cst_10 = arith.constant dense<0.000000e+00> : vector<16xf32>
    %29 = vector.multi_reduction <add>, %28, %cst_10 [1] : vector<16x128xf32> to vector<16xf32>
    %30 = vector.shape_cast %29 : vector<16xf32> to vector<16x1xf32>
    %cst_11 = arith.constant 1.280000e+02 : f32
    %31 = vector.broadcast %cst_11 : f32 to vector<16x1xf32>
    %32 = arith.divf %30, %31 : vector<16x1xf32>
    %33 = vector.broadcast %32 : vector<16x1xf32> to vector<16x128xf32>
    %34 = arith.subf %28, %33 : vector<16x128xf32>
    %35 = arith.mulf %34, %34 : vector<16x128xf32>
    %cst_12 = arith.constant dense<0.000000e+00> : vector<16xf32>
    %36 = vector.multi_reduction <add>, %35, %cst_12 [1] : vector<16x128xf32> to vector<16xf32>
    %37 = vector.shape_cast %36 : vector<16xf32> to vector<16x1xf32>
    %cst_13 = arith.constant 1.280000e+02 : f32
    %38 = vector.broadcast %cst_13 : f32 to vector<16x1xf32>
    %39 = arith.divf %37, %38 : vector<16x1xf32>
    %cst_14 = arith.constant 9.99999974E-6 : f32
    %40 = vector.broadcast %cst_14 : f32 to vector<16x1xf32>
    %41 = arith.addf %39, %40 : vector<16x1xf32>
    %42 = math.rsqrt %41 : vector<16x1xf32>
    %43 = vector.broadcast %42 : vector<16x1xf32> to vector<16x128xf32>
    %44 = arith.mulf %34, %43 : vector<16x128xf32>
    %c0_15 = arith.constant 0 : index
    %c0_16 = arith.constant 0 : index
    %45 = vector.load %arg6[%c0_15, %c0_16] : memref<16x128xf32, #tpu.memory_space<vmem>>, vector<16x128xf32>
    tpu.vector_store %arg6[%c0_15, %c0_16], %44 {strides = array<i32>} : memref<16x128xf32, #tpu.memory_space<vmem>>, vector<16x128xf32>,
    %46 = arith.truncf %44 : vector<16x128xf32> to vector<16x128xbf16>
    %c0_17 = arith.constant 0 : index
    %c0_18 = arith.constant 0 : index
    %c0_19 = arith.constant 0 : index
    %47 = vector.load %arg5[%c0_17, %c0_18, %c0_19] : memref<1x16x128xbf16, #tpu.memory_space<vmem>>, vector<1x16x128xbf16>
    %48 = vector.shape_cast %47 : vector<1x16x128xbf16> to vector<16x128xbf16>
    %49 = vector.shape_cast %46 : vector<16x128xbf16> to vector<1x16x128xbf16>
    tpu.vector_store %arg5[%c0_17, %c0_18, %c0_19], %49 {strides = array<i32>} : memref<1x16x128xbf16, #tpu.memory_space<vmem>>, vector<1x16x128xbf16>,
    return
  }
  func.func @transform_0(%arg0: i32, %arg1: i32) -> (i32, i32) {
    %c0_i32 = arith.constant 0 : i32
    %c0_i32_0 = arith.constant 0 : i32
    return %arg0, %c0_i32 : i32, i32
  }
  func.func @transform_1(%arg0: i32, %arg1: i32) -> (i32, i32, i32) {
    %c0_i32 = arith.constant 0 : i32
    %c0_i32_0 = arith.constant 0 : i32
    %c0_i32_1 = arith.constant 0 : i32
    %c0_i32_2 = arith.constant 0 : i32
    return %c0_i32, %c0_i32_0, %c0_i32_1 : i32, i32, i32
  }
  func.func @transform_2(%arg0: i32, %arg1: i32) -> (i32, i32, i32) {
    %c0_i32 = arith.constant 0 : i32
    %c0_i32_0 = arith.constant 0 : i32
    %c0_i32_1 = arith.constant 0 : i32
    %c0_i32_2 = arith.constant 0 : i32
    return %c0_i32, %c0_i32_0, %c0_i32_1 : i32, i32, i32
  }
  func.func @transform_3(%arg0: i32, %arg1: i32) -> (i32, i32, i32) {
    %c0_i32 = arith.constant 0 : i32
    %c0_i32_0 = arith.constant 0 : i32
    return %arg1, %arg0, %c0_i32 : i32, i32, i32
  }
}

</mosaic_0001>

<bundles_post_ra>
// kernel: tpu_custom_call.1
= control target key start
LH: loop header
LB: loop body
LE: loop exit
PB: predicated region body
PF: predicated region fallthrough
CT: control target
= control target key end

     0   :  { %8 = vsyncpa [#allocation4], 0  ;;  %s1033_s0 = inlined_call_operand.hbm [shape: bf16[16,128], index: 0, kind: input, shape index: {}]   ;;  %s1034_s1 = inlined_call_operand.hbm [shape: bf16[2,128,128], index: 1, kind: input, shape index: {}]   ;;  %s1035_s2 = inlined_call_operand.vmem [shape: bf16[2,1,128], index: 2, kind: input, shape index: {}]   ;;  %s1036_s3 = inlined_call_operand.hbm [shape: bf16[2,16,128], index: 3, kind: output, shape index: {}]  }
   0x1   :  { %9 = vsyncpa [#allocation7], 0 }
   0x2   :  { %10 = vsyncpa [#allocation5], 0 }
   0x3   :  { %12 = vsyncpa [#allocation5 + $0x1], 0  ;;  %s831_s12 = smov 0   ;;  %s833_s13 = smov 0  }
   0x4   :  { %s835_s14 = smov 0   ;;  %s837_s15 = smov 0  }
   0x5   :  { %s839_s16 = smov 0   ;;  %s841_s17 = smov 0  }
   0x6 LB: > { %s491_s18 = sadd.s32 4294967295, %s800_s17   ;;  %s492_s19 = sadd.s32 4294967294, %s800_s17   ;;  %s800_s17 = sphi %s841_s17, %s18_s17   ;;  %s796_s16 = sphi %s839_s16, %s1054_s16   ;;  %s792_s15 = sphi %s837_s15, %s1053_s15   ;;  %s788_s14 = sphi %s835_s14, %s1052_s14   ;;  %s784_s13 = sphi %s833_s13, %s1051_s13   ;;  %s780_s12 = sphi %s831_s12, %s1050_s12  }
   0x7   : > { %s27_s20 = sadd.s32 1, %s796_s16  ;;  %s107_s21 = sadd.s32 1, %s788_s14 }
   0x8   : > { %p28_p0 = scmp.ge.s32.totalorder %s27_s20, 2  ;;  %p117_p1 = scmp.ne.s32.totalorder %s788_s14, %s784_s13 }
   0x9   : > { %p118_p2 = scmp.eq.s32.totalorder %s491_s18, 1  ;;  %p123_p3 = scmp.ne.s32.totalorder %s784_s13, %s780_s12 }
   0xa   : > { %s1056_s20 = smov (%p28_p0, %s27_s20), 0  ;;  %p124_p5 = scmp.eq.s32.totalorder %s492_s19, 1 }
   0xb   : > { %p871_p4 = por %p118_p2, %p117_p1  ;;  %s102_s23 = ssub.s32 %s796_s16, %s1056_s20 }
   0xc   : > { %p493_p6 = scmp.ge.s32.totalorder %s800_s17, 1  ;;  %p105_p7 = scmp.eq.s32.totalorder %s102_s23, 0 }
   0xd   : > { %s1041_s22 = scalar_select %p871_p4, 1, 0 }
   0xe   : > { %p878_p8 = por %p124_p5, %p123_p3  ;;  %p131_p9 = scmp.lt.s32.totalorder %s800_s17, 3 }
   0xf   : > { %s884_s25 = scalar_select %p105_p7, %s788_s14, %s107_s21  }
  0x10   : > { %s1042_s24 = scalar_select %p878_p8, 1, 0 }
  0x11   : > { %p886_p10 = pnand %p493_p6, %p131_p9  ;;  %p890_p11 = scmp.eq.s32.totalorder %s491_s18, 0 }
  0x12   : > { %s802_s28 = smov [#allocation3]   ;;  %s803_s4 = smov [#allocation6]  }
  0x13   : > { %s1043_s26 = scalar_select %p886_p10, 1, 0 }
  0x14   : > { %s1044_s27 = scalar_select %p890_p11, 1, 0 }
  0x15   : > { %p570_p12 = pneg %p886_p10  ;;  %s146_s29 = sshll.u32 %s802_s28, 4  ;;  %s147_s29 = int_to_ptr.vmem [resolvable:$true] %s146_s29 }
  0x16   : > { %s159_s5 = sshll.u32 %s803_s4, 4  ;;  %s658_s8 = scalar_lea.hbm %s1033_s0, 128  ;;  %s902_s5 = int_to_ptr.vmem [resolvable:$true] %s159_s5 }
  0x17   : > { %p898_p13 = pnand %p890_p11, %p570_p12  ;;  %p659_p0 = scmp.ne.s32.totalorder %s1033_s0, %s658_s8 }
  0x18   : > { %p665_p5 = scmp.lt.u32.totalorder %s658_s8, %s1033_s0 }
  0x19   : > { %p660_p1 = pneg %p898_p13 }
  0x1b   : > { %p661_p2 = pnand %p660_p1, %p659_p0 }
  0x1d   : > { %p662_p3 = pneg %p661_p2 }
  0x1f   : > { %p667_p6 = pnand %p665_p5, %p662_p3 }
  0x21   : > { %670 = shalt.err (!%p667_p6)
}
  0x22   : > { %s671_s19 = scalar_lea.vmem %s147_s29, 128  ;;  %p679_p8 = scmp.lt.s32.totalorder %s147_s29, %s147_s29 }
  0x23   : > { %p672_p7 = scmp.ne.s32.totalorder %s147_s29, %s671_s19  ;;  %p680_p4 = scmp.lt.s32.totalorder %s671_s19, %s671_s19 }
  0x25   : > { %p674_p9 = pnand %p672_p7, %p660_p1  ;;  %p681_p11 = por %p680_p4, %p679_p8 }
  0x27   : > { %p675_p12 = pneg %p674_p9 }
  0x29   : > { %p682_p10 = pnand %p681_p11, %p675_p12 }
  0x2b   : > { %685 = shalt.err (!%p682_p10)
}
  0x2c   : > { %s804_s21 = smov 64   ;;  %s805_s23 = smov 4  }
  0x2d   : > { %573 = dma.hbm_to_vmem [thread:$0]  (!%p898_p13), %s1033_s0, 128, %s147_s29, [#allocation4], %s804_s21, %s804_s21, %s805_s23  }
  0x2e   : > { %s686_s8 = scalar_lea.hbm %s1034_s1, 2048 }
  0x2f   : > { %p687_p0 = scmp.ne.s32.totalorder %s1034_s1, %s686_s8  ;;  %p693_p10 = scmp.lt.u32.totalorder %s686_s8, %s1034_s1 }
  0x31   : > { %p689_p4 = pnand %p687_p0, %p660_p1 }
  0x33   : > { %p690_p8 = pneg %p689_p4 }
  0x35   : > { %p695_p11 = pnand %p693_p10, %p690_p8 }
  0x37   : > { %698 = shalt.err (!%p695_p11)
}
  0x38   : > { %s699_s29 = scalar_lea.vmem %s902_s5, 2048  ;;  %p707_p6 = scmp.lt.s32.totalorder %s902_s5, %s902_s5 }
  0x39   : > { %p700_p2 = scmp.ne.s32.totalorder %s902_s5, %s699_s29  ;;  %p708_p7 = scmp.lt.s32.totalorder %s699_s29, %s699_s29 }
  0x3b   : > { %p702_p3 = pnand %p700_p2, %p660_p1  ;;  %p709_p9 = por %p708_p7, %p707_p6 }
  0x3d   : > { %p703_p5 = pneg %p702_p3 }
  0x3f   : > { %p710_p12 = pnand %p709_p9, %p703_p5 }
  0x41   : > { %713 = shalt.err (!%p710_p12)
}
  0x42   : > { %576 = dma.hbm_to_vmem [thread:$0]  (!%p898_p13), %s1034_s1, 2048, %s902_s5, [#allocation7], %s804_s21, %s804_s21, %s805_s23  }
  0x43   : > { %p1046_p0 = scmp.ne.s32.totalorder %s1043_s26, 0 }
  0x44   : > { %p1047_p4 = scmp.ne.s32.totalorder (!%p1046_p0), %s1044_s27, 0 }
  0x45   : > { %178 = sbr.rel (%p1046_p0) target bundleno = 693 (0x2b5), region = 32 }
  0x4c   : > { %767 = dma.done.wait (%p1047_p4), [#allocation4], 128  }
  0x4d   : > { %769 = vsyncadd (%p1047_p4), [#allocation4], 4294967168 }
  0x4e   : > { %771 = dma.done.wait (%p1047_p4), [#allocation7], 2048  }
  0x4f   : > { %773 = vsyncadd (%p1047_p4), [#allocation7], 4294965248  ;;  %s198_s30 = sand.u32 1, %s784_s13   ;;  %p500_p13 = scmp.ne.s32.totalorder %s792_s15, 0 }
  0x50   : > { %s964_s5 = sshll.u32 %s198_s30, 3  ;;  %v523_v0 = vld [vmem:[#allocation3] sm:$0xff] (!%p500_p13)  }
  0x51   : > { %s200_s26 = scalar_lea.vmem [#allocation8], %s964_s5  ;;  %207 = sbr.rel (%p500_p13) target bundleno = 88 (0x58), region = 44  ;;  %v524_v1 = vunpack.c.l.bf16 (!%p500_p13), %v523_v0  ;;  %v525_v2 = vunpack.c.h.bf16 (!%p500_p13), %v523_v0 }
  0x53   : > { %212 = vst [vmem:[#allocation2] sm:$0xff] (!%p500_p13), %v524_v1  ;;  %213 = vst [vmem:[#allocation2 + $0x8] sm:$0xff] (!%p500_p13), %v525_v2 }
  0x58 PF: > { %s518_s27 = sshll.u32 %s792_s15, 6  ;;  %v806_v3 = vmov 0.0   ;;  %vm807_vm0 = vmmov 0   ;;  %v239_v15 = vlaneseq  ;;  %s235_s6 = scalar_lea.vmem %s1035_s2, %s792_s15 }
  0x59   : > { %540 = vmatprep.subr.bf16.mxu0 %v806_v3  ;;  %556 = vmatprep.mubr.msk.bf16.mxu0 %vm807_vm0, %v806_v3  ;;  %s218_s21 = scalar_lea.vmem [#allocation6], %s518_s27  ;;  %v236_v17 = vld [vmem:[%s235_s6] sm:$0x1]  ;;  %s521_s7 = sshll.u32 %s792_s15, 7 }
  0x5a   : > { %v642_v4 = vld [vmem:[%s218_s21] sm:$0xff]   ;;  %v643_v5 = vld [vmem:[%s218_s21 + $0x8] sm:$0xff]   ;;  %v644_v6 = vld [vmem:[%s218_s21 + $0x10] sm:$0xff]   ;;  %v240_v16 = vshrl.u32 %v239_v15, 7  ;;  %v237_v18 = vunpack.c.l.bf16 %v236_v17  ;;  %s403_s8 = sshll.u32 %s200_s26, 4  ;;  %s979_s11 = scalar_lea.hbm %s1036_s3, %s521_s7  ;;  %s981_s8 = int_to_ptr.vmem [resolvable:$true] %s403_s8 }
  0x5b   : > { %541 = vmatpush3.bf16.msra.mxu0 %v642_v4  ;;  %v645_v7 = vld [vmem:[%s218_s21 + $0x18] sm:$0xff]   ;;  %v646_v8 = vld [vmem:[%s218_s21 + $0x20] sm:$0xff]   ;;  %v647_v9 = vld [vmem:[%s218_s21 + $0x28] sm:$0xff]   ;;  %s987_s15 = scalar_lea.sflag [#allocation5], %s198_s30  ;;  %s714_s18 = scalar_lea.vmem %s981_s8, 128 }
  0x5c   : > { %542 = vmatprep.subr.bf16.mxu0 %v806_v3  ;;  %v648_v10 = vld [vmem:[%s218_s21 + $0x30] sm:$0xff]   ;;  %v649_v11 = vld [vmem:[%s218_s21 + $0x38] sm:$0xff]   ;;  %v214_v12 = vld [vmem:[#allocation2] sm:$0xff]  ;;  %v241_v19 = vsub.s32 0, %v240_v16  ;;  %p715_p1 = scmp.ne.s32.totalorder %s981_s8, %s714_s18  ;;  %p1048_p8 = scmp.ne.s32.totalorder %s1041_s22, 0 }
  0x5d   : > { %v215_v13 = vld [vmem:[#allocation2 + $0x8] sm:$0xff]  ;;  %s808_s29 = smov [#allocation8]  }
  0x5e   : > { %v238_v14 = vpack.c.bf16 %v215_v13, %v214_v12  ;;  %v242_v20 = vrot.slane %v237_v18, %v241_v19  ;;  %p716_p10 = pnand %p715_p1, %p1048_p8  ;;  %s718_s19 = sshll.u32 %s808_s29, 4  ;;  %s719_s19 = int_to_ptr.vmem [resolvable:$false] %s718_s19 }
  0x5f   : > { %543 = vmatpush3.bf16.msra.mxu0 %v643_v5  ;;  %s720_s28 = scalar_lea.vmem %s719_s19, 256  ;;  %p721_p2 = scmp.lt.s32.totalorder %s981_s8, %s719_s19 }
  0x60   : > { %544 = vmatprep.subr.bf16.mxu0 %v806_v3  ;;  %p717_p11 = pneg %p716_p10  ;;  %p722_p3 = scmp.lt.s32.totalorder %s720_s28, %s714_s18 }
  0x62   : > { %p723_p5 = por %p722_p3, %p721_p2 }
  0x63   : > { %545 = vmatpush3.bf16.msra.mxu0 %v644_v6 }
  0x64   : > { %546 = vmatprep.subr.bf16.mxu0 %v806_v3  ;;  %p724_p6 = pnand %p723_p5, %p717_p11 }
  0x67   : > { %547 = vmatpush3.bf16.msra.mxu0 %v645_v7 }
  0x68   : > { %548 = vmatprep.subr.bf16.mxu0 %v806_v3 }
  0x6b   : > { %549 = vmatpush3.bf16.msra.mxu0 %v646_v8 }
  0x6c   : > { %550 = vmatprep.subr.bf16.mxu0 %v806_v3 }
  0x6f   : > { %551 = vmatpush3.bf16.msra.mxu0 %v647_v9 }
  0x70   : > { %552 = vmatprep.subr.bf16.mxu0 %v806_v3 }
  0x73   : > { %553 = vmatpush3.bf16.msra.mxu0 %v648_v10 }
  0x74   : > { %554 = vmatprep.subr.bf16.mxu0 %v806_v3 }
  0x77   : > { %555 = vmatpush3.bf16.msra.mxu0 %v649_v11 }
  0x7a   : > { %557 = vmatmul.mubr.bf16.vlgmr.msra.gmra.mrb[0].mxu0 %v238_v14 }
 0x14d   : > { %v325_v21 = vpop.f32.mrb[0].mxu0 }
 0x14e   : > { %v326_v22 = vadd.f32 %v325_v21, %v242_v20  ;;  %v558_v23 = vpop.f32.mrb[1].mxu0 }
 0x14f   : > { %v328_v24 = vpop.f32.mrb[2].mxu0 }
 0x150   : > { %v332_v25 = vmul.f32 %v326_v22, %v326_v22  ;;  %v329_v26 = vadd.f32 %v328_v24, %v242_v20  ;;  %v559_v27 = vpop.f32.mrb[3].mxu0 }
 0x152   : > { %v334_v28 = vmul.f32 %v332_v25, %v326_v22  ;;  %v333_v29 = vmul.f32 %v329_v26, %v329_v26 }
 0x154   : > { %v336_v30 = vmul.f32 0.044715, %v334_v28  ;;  %v335_v31 = vmul.f32 %v333_v29, %v329_v26 }
 0x156   : > { %v338_v32 = vadd.f32 %v336_v30, %v326_v22  ;;  %v337_v33 = vmul.f32 0.044715, %v335_v31 }
 0x158   : > { %v340_v34 = vmul.f32 0.7978846, %v338_v32  ;;  %v339_v35 = vadd.f32 %v337_v33, %v329_v26 }
 0x15a   : > { %v341_v36 = vmul.f32 0.7978846, %v339_v35  ;;  %650 = vtanh.f32 %v340_v34 }
 0x15c   : > { %652 = vtanh.f32 %v341_v36 }
 0x164   : > { %v651_v37 = vpop.eup %650 }
 0x165   : > { %v344_v38 = vadd.f32 1.0, %v651_v37 }
 0x166   : > { %v653_v39 = vpop.eup %652 }
 0x167   : > { %v346_v40 = vmul.f32 0.5, %v344_v38  ;;  %v345_v41 = vadd.f32 1.0, %v653_v39 }
 0x169   : > { %v348_v42 = vmul.f32 %v346_v40, %v326_v22  ;;  %v347_v43 = vmul.f32 0.5, %v345_v41 }
 0x16b   : > { %v350_v44 = vadd.f32 %v348_v42, %v214_v12  ;;  %v349_v45 = vmul.f32 %v347_v43, %v329_v26 }
 0x16d   : > { %352 = vadd.xlane.f32.xlu0 %v350_v44  ;;  %v351_v46 = vadd.f32 %v349_v45, %v215_v13 }
 0x171   : > { %354 = vadd.xlane.f32.xlu0 %v351_v46 }
 0x1fa   : > { %v353_v47 = vpop.xlane.xlu0 %352 }
 0x1fb   : > { %v357_v48 = vmul.f32 0.0078125, %v353_v47 }
 0x1fd   : > { %v359_v49 = vsub.f32 %v350_v44, %v357_v48 }
 0x1fe   : > { %v355_v50 = vpop.xlane.xlu0 %354 }
 0x1ff   : > { %v358_v51 = vmul.f32 0.0078125, %v355_v50  ;;  %v361_v52 = vmul.f32 %v359_v49, %v359_v49 }
 0x201   : > { %v360_v53 = vsub.f32 %v351_v46, %v358_v51  ;;  %363 = vadd.xlane.f32.xlu1 %v361_v52 }
 0x203   : > { %v362_v54 = vmul.f32 %v360_v53, %v360_v53 }
 0x205   : > { %365 = vadd.xlane.f32.xlu1 %v362_v54 }
 0x28e   : > { %v364_v55 = vpop.xlane.xlu1 %363 }
 0x28f   : > { %v367_v56 = vmul.f32 0.0078125, %v364_v55 }
 0x291   : > { %v369_v57 = vadd.f32 1e-05, %v367_v56 }
 0x292   : > { %v366_v58 = vpop.xlane.xlu1 %365 }
 0x293   : > { %654 = vrsqrt.f32 %v369_v57  ;;  %v368_v59 = vmul.f32 0.0078125, %v366_v58 }
 0x295   : > { %v370_v60 = vadd.f32 1e-05, %v368_v59 }
 0x297   : > { %656 = vrsqrt.f32 %v370_v60 }
 0x29d   : > { %v655_v61 = vpop.eup %654 }
 0x29e   : > { %v373_v62 = vmul.f32 %v655_v61, %v359_v49 }
 0x2a0   : > { %375 = vst [vmem:[#allocation2] sm:$0xff] %v373_v62 }
 0x2a1   : > { %v657_v63 = vpop.eup %656 }
 0x2a2   : > { %v374_v0 = vmul.f32 %v657_v63, %v360_v53 }
 0x2a4   : > { %376 = vst [vmem:[#allocation2 + $0x8] sm:$0xff] %v374_v0  ;;  %v529_v1 = vpack.c.bf16 %v374_v0, %v373_v62 }
 0x2a6   : > { %530 = vst [vmem:[%s200_s26] sm:$0xff] %v529_v1  }
 0x2a7   : > { %727 = shalt.err (!%p724_p6)
}
 0x2a8   : > { %s728_s30 = scalar_lea.hbm %s979_s11, 128  ;;  %s732_s27 = scalar_lea.hbm %s1036_s3, 256 }
 0x2a9   : > { %p729_p7 = scmp.ne.s32.totalorder %s979_s11, %s728_s30  ;;  %p733_p0 = scmp.lt.u32.totalorder %s979_s11, %s1036_s3 }
 0x2aa   : > { %p734_p4 = scmp.lt.u32.totalorder %s732_s27, %s728_s30  ;;  %p736_p1 = scmp.lt.u32.totalorder %s728_s30, %s979_s11 }
 0x2ab   : > { %p730_p9 = pnand %p729_p7, %p1048_p8 }
 0x2ac   : > { %p735_p13 = por %p734_p4, %p733_p0 }
 0x2ad   : > { %p731_p12 = pneg %p730_p9 }
 0x2ae   : > { %p737_p10 = por %p736_p1, %p735_p13 }
 0x2b0   : > { %p738_p11 = pnand %p737_p10, %p731_p12 }
 0x2b2   : > { %741 = shalt.err (!%p738_p11)
}
 0x2b3   : > { %s809_s4 = smov 64   ;;  %s810_s6 = smov 4  }
 0x2b4   : > { %568 = dma.vmem_to_hbm [thread:$0]  (%p1048_p8), %s981_s8, 128, %s979_s11, %s987_s15, %s809_s4, %s809_s4, %s810_s6  }
 0x2b5 PF: > { %p585_p2 = scmp.ge.s32.totalorder %s800_s17, 2  ;;  %s418_s7 = sand.u32 1, %s780_s12  }
 0x2b6   : > { %p1049_p3 = scmp.ne.s32.totalorder %s1042_s24, 0  ;;  %s419_s9 = scalar_lea.sflag [#allocation5], %s418_s7 }
 0x2b8   : > { %p578_p5 = pnand %p585_p2, %p1049_p3 }
 0x2ba   : > { %775 = dma.done.wait (!%p578_p5), %s419_s9, 128  }
 0x2bb   : > { %777 = vsyncadd (!%p578_p5), %s419_s9, 4294967168  ;;  %s18_s17 = sadd.s32 1, %s800_s17   ;;  %s1050_s12 = smov %s784_s13 }
 0x2bc   : > { %p15_p6 = scmp.ge.s32.totalorder %s18_s17, 4   ;;  %s1051_s13 = smov %s788_s14 }
 0x2bd   : > { %s1052_s14 = smov %s884_s25  ;;  %s1053_s15 = smov %s796_s16 }
 0x2be   : > { %s1054_s16 = smov %s1056_s20  ;;  %17 = sbr.rel (!%p15_p6) target bundleno = 6 (0x6), region = 80 }
 0x2c5   :  { %424 = vsyncpa [#allocation4], 1 }
 0x2c6   :  { %426 = vsyncpa [#allocation4 + $0x1], 1 }
 0x2c7   :  { %427 = vsyncpa [#allocation7], 1 }
 0x2c8   :  { %428 = vsyncpa [#allocation5], 1 }
 0x2c9   :  { %430 = vsyncpa [#allocation5 + $0x1], 1 }

</bundles_post_ra>
